<compile_context>
chip_gen: v5e
topology: v5e:2x2
jax: 0.10.0
libtpu: 0.0.40
codegen_flags: <defaults>
</compile_context>

<pallas_src>
import functools

import jax
import jax.numpy as jnp
from jax.experimental import pallas as pl
from jax.experimental.pallas import tpu as pltpu


# --------------------------------------------------------------------------- #
# Kernels
# --------------------------------------------------------------------------- #
def _ffn_kernel_resident(x_ref, w1_ref, b1_ref, w2_ref, b2_ref, o_ref):
    # Whole d_ff resident: single fused pass, no accumulator scratch.
    h = jnp.dot(x_ref[...], w1_ref[...], preferred_element_type=jnp.float32)
    h = jnp.maximum(h + b1_ref[...].astype(jnp.float32), 0.0)
    y = jnp.dot(h.astype(w2_ref.dtype), w2_ref[...],
                preferred_element_type=jnp.float32)
    o_ref[...] = (y + b2_ref[...].astype(jnp.float32)).astype(o_ref.dtype)


def _ffn_kernel_streamed(x_ref, w1_ref, b1_ref, w2_ref, b2_ref, o_ref, acc_ref):
    # d_ff streamed in chunks along grid axis j (reduction axis, last).
    j = pl.program_id(1)

    # Fold b2 into the accumulator init (no epilogue VPU add pass).
    @pl.when(j == 0)
    def _():
        acc_ref[...] = jnp.broadcast_to(
            b2_ref[...].astype(jnp.float32), acc_ref.shape)

    h = jnp.dot(x_ref[...], w1_ref[...], preferred_element_type=jnp.float32)
    h = jnp.maximum(h + b1_ref[...].astype(jnp.float32), 0.0)
    acc_ref[...] += jnp.dot(h.astype(w2_ref.dtype), w2_ref[...],
                            preferred_element_type=jnp.float32)

    @pl.when(j == pl.num_programs(1) - 1)
    def _():
        o_ref[...] = acc_ref[...].astype(o_ref.dtype)


# --------------------------------------------------------------------------- #
# Tiling heuristics (bytes- and generation-aware)
# --------------------------------------------------------------------------- #
def _round_up(x, m):
    return (x + m - 1) // m * m


def _vmem_capacity_bytes():
    # 64 MiB per TensorCore on v7x, 128 MiB on v5e/v6e.
    try:
        return int(pltpu.get_tpu_info().vmem_capacity_bytes)
    except Exception:
        return 64 << 20  # conservative fallback (v7x)


def _vmem_footprint(tm, tff, n_ff, d_model, x_isz, w_isz, out_isz, wbuf):
    weights = wbuf * (2 * d_model * tff) * w_isz          # W1 + W2 chunks
    biases = wbuf * (tff + d_model) * 4                   # b1 + b2 (f32)
    x_tiles = 2 * tm * d_model * x_isz                    # double-buffered x
    out_tiles = 2 * tm * d_model * out_isz                # double-buffered out
    acc = 0 if n_ff == 1 else tm * d_model * 4            # f32 accumulator
    h_interm = tm * tff * 4                               # in-flight f32 hidden
    return weights + biases + x_tiles + out_tiles + acc + h_interm


def _select_tiling(N, d_model, d_ff, x_isz, w_isz, out_isz, budget, tm_req, tff_req):
    n_rows = _round_up(max(N, 8), 8)

    if tff_req is not None:
        assert d_ff % tff_req == 0, "tff must divide d_ff"
        tff_list = [tff_req]
    else:
        # Residency first, then 256-aligned chunks (dense 2x256^2 MXU tiles on
        # v6e/v7x; 128 fallback only for shapes that need it / v5e).
        tff_list = [d_ff]
        for c in (2048, 1024, 512, 256, 128):
            if c < d_ff and d_ff % c == 0:
                tff_list.append(c)

    if tm_req is not None:
        tm_list = [min(_round_up(tm_req, 8), n_rows)]
    else:
        tm_list = []
        for t in (1024, 512, 256, 128, 64, 32, 16, 8):
            t = min(t, n_rows)
            if t not in tm_list:
                tm_list.append(t)

    # Prefer resident weights with the largest token tile; otherwise the
    # largest (tm, tff) pair that fits (amortizes streamed-weight HBM traffic).
    for tff_c in tff_list:
        n_ff = d_ff // tff_c
        wbuf = 1 if n_ff == 1 else 2
        for tm_c in tm_list:
            if tm_c * tff_c * 4 > (4 << 20):   # cap f32 hidden intermediate
                continue
            fp = _vmem_footprint(tm_c, tff_c, n_ff, d_model,
                                 x_isz, w_isz, out_isz, wbuf)
            if fp <= budget:
                return tm_c, tff_c, n_ff
    # Fallback (explicitly forced tiles or pathological shapes).
    tff_c = tff_list[-1]
    tm_c = tm_list[-1]
    return tm_c, tff_c, d_ff // tff_c


# --------------------------------------------------------------------------- #
# Wrapper
# --------------------------------------------------------------------------- #
@functools.partial(jax.jit, static_argnames=("tm", "tff", "compute_dtype"))
def positionwise_feed_forward(x, w1, b1, w2, b2, *, tm=None, tff=None,
                              compute_dtype=jnp.bfloat16):
    """x: (B, S, d_model) -> (B, S, d_model).  Eval-mode FFN (dropout = id)."""
    B, S, d_model = x.shape
    d_ff = w1.shape[1]
    N = B * S
    out_dtype = x.dtype

    # bf16 matmul operands by default (native MXU rate); f32 accumulation.
    if compute_dtype is not None:
        x = x.astype(compute_dtype)
        w1 = w1.astype(compute_dtype)
        w2 = w2.astype(compute_dtype)

    x_isz = jnp.dtype(x.dtype).itemsize
    w_isz = jnp.dtype(w1.dtype).itemsize
    out_isz = jnp.dtype(out_dtype).itemsize

    vmem_cap = _vmem_capacity_bytes()
    budget = int(0.70 * vmem_cap)

    tm_eff, tff_eff, n_ff = _select_tiling(
        N, d_model, d_ff, x_isz, w_isz, out_isz, budget, tm, tff)

    n_i = pl.cdiv(N, tm_eff)
    # Megacore: make the parallel i axis have >= 2 iterations when possible.
    if tm is None and n_i == 1 and N >= 16:
        tm_eff = _round_up(pl.cdiv(N, 2), 8)
        n_i = pl.cdiv(N, tm_eff)

    x2d = x.reshape(N, d_model)          # no padding: Pallas masks ragged tile
    b1_2d = b1.reshape(1, d_ff)
    b2_2d = b2.reshape(1, d_model)

    # Weight-chunk buffering: resident weights (constant index_map) are never
    # re-fetched -> single buffer; streamed chunks get 3-deep prefetch if the
    # budget allows, else the default double buffer.
    if n_ff == 1:
        wbuf = 1
        w_mode = pl.Buffered(1)
    else:
        wbuf = 2
        w_mode = None
        if _vmem_footprint(tm_eff, tff_eff, n_ff, d_model,
                           x_isz, w_isz, out_isz, 3) <= budget:
            wbuf = 3
            w_mode = pl.Buffered(3)

    def _w_spec(shape, index_map):
        if w_mode is not None:
            return pl.BlockSpec(shape, index_map, pipeline_mode=w_mode)
        return pl.BlockSpec(shape, index_map)

    if n_ff == 1:
        grid_spec = pltpu.PrefetchScalarGridSpec(
            num_scalar_prefetch=0,
            grid=(n_i,),
            in_specs=[
                pl.BlockSpec((tm_eff, d_model), lambda i: (i, 0)),   # x tile
                _w_spec((d_model, d_ff), lambda i: (0, 0)),          # W1
                _w_spec((1, d_ff), lambda i: (0, 0)),                # b1
                _w_spec((d_ff, d_model), lambda i: (0, 0)),          # W2
                _w_spec((1, d_model), lambda i: (0, 0)),             # b2
            ],
            out_specs=pl.BlockSpec((tm_eff, d_model), lambda i: (i, 0)),
            scratch_shapes=[],
        )
        kernel = _ffn_kernel_resident
        dim_sem = ("parallel",)
    else:
        grid_spec = pltpu.PrefetchScalarGridSpec(
            num_scalar_prefetch=0,
            grid=(n_i, n_ff),                      # reduction (d_ff) axis last
            in_specs=[
                pl.BlockSpec((tm_eff, d_model), lambda i, j: (i, 0)),  # x tile
                _w_spec((d_model, tff_eff), lambda i, j: (0, j)),      # W1 chunk
                _w_spec((1, tff_eff), lambda i, j: (0, j)),            # b1 chunk
                _w_spec((tff_eff, d_model), lambda i, j: (j, 0)),      # W2 chunk
                pl.BlockSpec((1, d_model), lambda i, j: (0, 0)),       # b2
            ],
            out_specs=pl.BlockSpec((tm_eff, d_model), lambda i, j: (i, 0)),
            scratch_shapes=[pltpu.VMEM((tm_eff, d_model), jnp.float32)],
        )
        kernel = _ffn_kernel_streamed
        dim_sem = ("parallel", "arbitrary")

    # VMEM limit: sized from the actual footprint, clamped under physical VMEM.
    vmem_need = _vmem_footprint(tm_eff, tff_eff, n_ff, d_model,
                                x_isz, w_isz, out_isz, wbuf)
    hard_cap = min(int(0.90 * vmem_cap), 112 << 20)
    vmem_limit = min(max(int(vmem_need * 1.25) + (8 << 20), 32 << 20), hard_cap)

    weight_reads = (n_i if n_ff > 1 else 1)   # streamed weights re-read per i-tile
    cost = pl.CostEstimate(
        flops=int(4 * N * d_model * d_ff),
        transcendentals=0,
        bytes_accessed=int(
            N * d_model * x_isz
            + weight_reads * (2 * d_model * d_ff) * w_isz
            + (d_ff + d_model) * 4
            + N * d_model * out_isz),
    )

    out2d = pl.pallas_call(
        kernel,
        out_shape=jax.ShapeDtypeStruct((N, d_model), out_dtype),
        grid_spec=grid_spec,
        compiler_params=pltpu.CompilerParams(
            dimension_semantics=dim_sem,
            vmem_limit_bytes=vmem_limit),
        cost_estimate=cost,
    )(x2d, w1, b1_2d, w2, b2_2d)

    return out2d.reshape(B, S, d_model)


def _reference(x, w1, b1, w2, b2):
    h = jnp.maximum(x @ w1 + b1, 0.0)
    return h @ w2 + b2


if __name__ == "__main__":
    key = jax.random.PRNGKey(0)

    # ---- Test 1: resident-weight fast path, f32 compute (tight tolerance),
    #      exercises the megacore i-axis split (N=16 -> 2 row tiles).
    B, S, d_model, d_ff = 2, 8, 32, 64
    kx, kw1, kb1, kw2, kb2, key = jax.random.split(key, 6)
    x = jax.random.normal(kx, (B, S, d_model), dtype=jnp.float32)
    w1 = jax.random.normal(kw1, (d_model, d_ff), dtype=jnp.float32) * 0.05
    b1 = jax.random.normal(kb1, (d_ff,), dtype=jnp.float32) * 0.05
    w2 = jax.random.normal(kw2, (d_ff, d_model), dtype=jnp.float32) * 0.05
    b2 = jax.random.normal(kb2, (d_model,), dtype=jnp.float32) * 0.05

    out = jax.block_until_ready(
        positionwise_feed_forward(x, w1, b1, w2, b2, compute_dtype=jnp.float32))
    ref = _reference(x, w1, b1, w2, b2)
    assert out.shape == (B, S, d_model)
    assert jnp.allclose(out, ref, atol=1e-5, rtol=1e-5), "mismatch (test 1, f32 resident)"

    # ---- Test 2: ragged token count (N=10), streamed d_ff (n_ff=2, accumulator
    #      path), default bf16 compute (loose tolerance).
    B2, S2, dm2, dff2 = 2, 5, 128, 256
    kx, kw1, kb1, kw2, kb2, key = jax.random.split(key, 6)
    x2 = jax.random.normal(kx, (B2, S2, dm2), dtype=jnp.float32)
    w12 = jax.random.normal(kw1, (dm2, dff2), dtype=jnp.float32) * 0.05
    b12 = jax.random.normal(kb1, (dff2,), dtype=jnp.float32) * 0.05
    w22 = jax.random.normal(kw2, (dff2, dm2), dtype=jnp.float32) * 0.05
    b22 = jax.random.normal(kb2, (dm2,), dtype=jnp.float32) * 0.05

    out2 = jax.block_until_ready(
        positionwise_feed_forward(x2, w12, b12, w22, b22, tff=128))
    ref2 = _reference(x2, w12, b12, w22, b22)
    assert out2.shape == (B2, S2, dm2)
    assert jnp.allclose(out2, ref2, atol=5e-2, rtol=5e-2), "mismatch (test 2, bf16 streamed)"

    # ---- Test 3: same data, fully automatic tiling (bf16 resident default).
    out3 = jax.block_until_ready(
        positionwise_feed_forward(x2, w12, b12, w22, b22))
    assert jnp.allclose(out3, ref2, atol=5e-2, rtol=5e-2), "mismatch (test 3, bf16 resident)"

    print("KERNEL_OK")
</pallas_src>

<mosaic_0001>
module attributes {stable_mosaic.version = 11 : i64} {
  func.func @_ffn_kernel_resident(%arg0: i32, %arg1: memref<8x32xf32, #tpu.memory_space<vmem>>, %arg2: memref<32x64xf32, #tpu.memory_space<vmem>>, %arg3: memref<1x64xf32, #tpu.memory_space<vmem>>, %arg4: memref<64x32xf32, #tpu.memory_space<vmem>>, %arg5: memref<1x32xf32, #tpu.memory_space<vmem>>, %arg6: memref<8x32xf32, #tpu.memory_space<vmem>>) attributes {dimension_semantics = [#tpu.dimension_semantics<parallel>], iteration_bounds = array<i64: 2>, scalar_prefetch = 0 : i64, scratch_operands = 0 : i64, tpu.core_type = #tpu.core_type<tc>, window_params = [{transform_indices = @transform_0, window_bounds = array<i64: 8, 32>}, {pipeline_mode = #tpu.pipeline_mode<synchronous>, transform_indices = @transform_1, window_bounds = array<i64: 32, 64>}, {pipeline_mode = #tpu.pipeline_mode<synchronous>, transform_indices = @transform_2, window_bounds = array<i64: 1, 64>}, {pipeline_mode = #tpu.pipeline_mode<synchronous>, transform_indices = @transform_3, window_bounds = array<i64: 64, 32>}, {pipeline_mode = #tpu.pipeline_mode<synchronous>, transform_indices = @transform_4, window_bounds = array<i64: 1, 32>}, {transform_indices = @transform_5, window_bounds = array<i64: 8, 32>}]} {
    %c0 = arith.constant 0 : index
    %c0_0 = arith.constant 0 : index
    %0 = vector.load %arg1[%c0, %c0_0] : memref<8x32xf32, #tpu.memory_space<vmem>>, vector<8x32xf32>
    %c0_1 = arith.constant 0 : index
    %c0_2 = arith.constant 0 : index
    %1 = vector.load %arg2[%c0_1, %c0_2] : memref<32x64xf32, #tpu.memory_space<vmem>>, vector<32x64xf32>
    %cst = arith.constant dense<0.000000e+00> : vector<8x64xf32>
    %2 = tpu.matmul %0, %1, %cst {dimension_numbers = #tpu.dot_dimension_numbers<[1], [0], [0], [1], [0, 0, 1, 1], [], []>} : vector<8x32xf32>, vector<32x64xf32>, vector<8x64xf32> -> vector<8x64xf32>
    %c0_3 = arith.constant 0 : index
    %c0_4 = arith.constant 0 : index
    %3 = vector.load %arg3[%c0_3, %c0_4] : memref<1x64xf32, #tpu.memory_space<vmem>>, vector<1x64xf32>
    %4 = vector.broadcast %3 : vector<1x64xf32> to vector<8x64xf32>
    %5 = arith.addf %2, %4 : vector<8x64xf32>
    %cst_5 = arith.constant 0.000000e+00 : f32
    %6 = vector.broadcast %cst_5 : f32 to vector<8x64xf32>
    %7 = arith.maximumf %5, %6 : vector<8x64xf32>
    %c0_6 = arith.constant 0 : index
    %c0_7 = arith.constant 0 : index
    %8 = vector.load %arg4[%c0_6, %c0_7] : memref<64x32xf32, #tpu.memory_space<vmem>>, vector<64x32xf32>
    %cst_8 = arith.constant dense<0.000000e+00> : vector<8x32xf32>
    %9 = tpu.matmul %7, %8, %cst_8 {dimension_numbers = #tpu.dot_dimension_numbers<[1], [0], [0], [1], [0, 0, 1, 1], [], []>} : vector<8x64xf32>, vector<64x32xf32>, vector<8x32xf32> -> vector<8x32xf32>
    %c0_9 = arith.constant 0 : index
    %c0_10 = arith.constant 0 : index
    %10 = vector.load %arg5[%c0_9, %c0_10] : memref<1x32xf32, #tpu.memory_space<vmem>>, vector<1x32xf32>
    %11 = vector.broadcast %10 : vector<1x32xf32> to vector<8x32xf32>
    %12 = arith.addf %9, %11 : vector<8x32xf32>
    %c0_11 = arith.constant 0 : index
    %c0_12 = arith.constant 0 : index
    %13 = vector.load %arg6[%c0_11, %c0_12] : memref<8x32xf32, #tpu.memory_space<vmem>>, vector<8x32xf32>
    tpu.vector_store %arg6[%c0_11, %c0_12], %12 {strides = array<i32>} : memref<8x32xf32, #tpu.memory_space<vmem>>, vector<8x32xf32>,
    return
  }
  func.func @transform_0(%arg0: i32) -> (i32, i32) {
    %c0_i32 = arith.constant 0 : i32
    %c0_i32_0 = arith.constant 0 : i32
    return %arg0, %c0_i32 : i32, i32
  }
  func.func @transform_1(%arg0: i32) -> (i32, i32) {
    %c0_i32 = arith.constant 0 : i32
    %c0_i32_0 = arith.constant 0 : i32
    %c0_i32_1 = arith.constant 0 : i32
    return %c0_i32, %c0_i32_0 : i32, i32
  }
  func.func @transform_2(%arg0: i32) -> (i32, i32) {
    %c0_i32 = arith.constant 0 : i32
    %c0_i32_0 = arith.constant 0 : i32
    %c0_i32_1 = arith.constant 0 : i32
    return %c0_i32, %c0_i32_0 : i32, i32
  }
  func.func @transform_3(%arg0: i32) -> (i32, i32) {
    %c0_i32 = arith.constant 0 : i32
    %c0_i32_0 = arith.constant 0 : i32
    %c0_i32_1 = arith.constant 0 : i32
    return %c0_i32, %c0_i32_0 : i32, i32
  }
  func.func @transform_4(%arg0: i32) -> (i32, i32) {
    %c0_i32 = arith.constant 0 : i32
    %c0_i32_0 = arith.constant 0 : i32
    %c0_i32_1 = arith.constant 0 : i32
    return %c0_i32, %c0_i32_0 : i32, i32
  }
  func.func @transform_5(%arg0: i32) -> (i32, i32) {
    %c0_i32 = arith.constant 0 : i32
    %c0_i32_0 = arith.constant 0 : i32
    return %arg0, %c0_i32 : i32, i32
  }
}

</mosaic_0001>

<bundles_post_ra>
// kernel: positionwise_feed_forward.1
= control target key start
LH: loop header
LB: loop body
LE: loop exit
PB: predicated region body
PF: predicated region fallthrough
CT: control target
= control target key end

     0   :  { %10 = vsyncpa [#allocation3], 0  ;;  %s642_s0 = inlined_call_operand.vmem [shape: f32[16,32], index: 0, kind: input, shape index: {}]   ;;  %s643_s1 = inlined_call_operand.vmem [shape: f32[32,64], index: 1, kind: input, shape index: {}]   ;;  %s644_s2 = inlined_call_operand.vmem [shape: f32[1,64], index: 2, kind: input, shape index: {}]   ;;  %s645_s3 = inlined_call_operand.vmem [shape: f32[64,32], index: 3, kind: input, shape index: {}]   ;;  %s646_s4 = inlined_call_operand.vmem [shape: f32[1,32], index: 4, kind: input, shape index: {}]   ;;  %s647_s5 = inlined_call_operand.hbm [shape: f32[16,32], index: 5, kind: output, shape index: {}]  }
   0x1   :  { %12 = vsyncpa [#allocation3 + $0x1], 0  ;;  %s513_s18 = smov 0   ;;  %s515_s19 = smov 0  }
   0x2   :  { %s517_s20 = smov 0   ;;  %s519_s21 = smov 0  }
   0x3 LB: > { %s534_s22 = sadd.s32 4294967295, %s481_s21   ;;  %s366_s23 = sadd.s32 4294967294, %s481_s21   ;;  %s481_s21 = sphi %s519_s21, %s653_s21   ;;  %s477_s20 = sphi %s517_s20, %s652_s20   ;;  %s473_s19 = sphi %s515_s19, %s651_s19   ;;  %s469_s18 = sphi %s513_s18, %s650_s18  }
   0x4   : > { %s538_s24 = sadd.s32 1, %s481_s21   ;;  %s135_s25 = sadd.s32 1, %s477_s20 }
   0x5   : > { %s132_s26 = ssub.s32 %s481_s21, %s538_s24  ;;  %p145_p0 = scmp.ne.s32.totalorder %s477_s20, %s473_s19 }
   0x6   : > { %p133_p1 = scmp.eq.s32.totalorder %s132_s26, 0  ;;  %p146_p2 = scmp.eq.s32.totalorder %s534_s22, 1 }
   0x7   : > { %p151_p3 = scmp.ne.s32.totalorder %s473_s19, %s469_s18  ;;  %p152_p4 = scmp.eq.s32.totalorder %s366_s23, 1 }
   0x8   : > { %s549_s27 = scalar_select %p133_p1, %s477_s20, %s135_s25  }
   0x9   : > { %p551_p5 = por %p146_p2, %p145_p0  ;;  %p555_p6 = por %p152_p4, %p151_p3 }
   0xa   : > { %p369_p7 = scmp.ge.s32.totalorder %s481_s21, 1  ;;  %p189_p8 = scmp.lt.s32.totalorder %s481_s21, 3 }
   0xc   : > { %p190_p9 = pnand %p369_p7, %p189_p8 }
   0xd   : > { %p216_p10 = scmp.lt.s32.totalorder (!%p190_p9), %s534_s22, 1  ;;  %s375_s6 = sshll.u32 (!%p190_p9), %s534_s22, 3 }
   0xe   : > { %193 = sbr.rel (%p190_p9) target bundleno = 288 (0x120), region = 40  ;;  %s302_s9 = scalar_lea.hbm (!%p190_p9), %s647_s5, %s375_s6 }
   0xf   : > { %s306_s14 = sshll.u32 (!%p190_p9), %s302_s9, 4  ;;  %s439_s25 = scalar_lea.hbm (!%p190_p9), %s647_s5, 16  ;;  %s307_s14 = int_to_ptr.hbm [resolvable:$true] %s306_s14 }
  0x13   : > { %v224_v0 = vld [vmem:[%s643_s1 + $0x18] sm:$0xff]  ;;  %v223_v1 = vld [vmem:[%s643_s1 + $0x10] sm:$0xff]  ;;  %v222_v4 = vld [vmem:[%s643_s1 + $0x8] sm:$0xff]  ;;  %s217_s15 = scalar_select %p216_p10, %s534_s22, 1  ;;  %vm229_vm0 = vcmask 261120   ;;  %vm266_vm1 = vcmask 523264  }
  0x14   : > { %245 = vmatpush.msra.mxu0 %v224_v0  ;;  %v261_v2 = vld [vmem:[%s645_s3 + $0x38] sm:$0xff]  ;;  %v260_v3 = vld [vmem:[%s645_s3 + $0x30] sm:$0xff]  ;;  %v259_v5 = vld [vmem:[%s645_s3 + $0x28] sm:$0xff]  ;;  %s433_s22 = sshra.s32 %s307_s14, 4  ;;  %s434_s22 = int_to_ptr.hbm [resolvable:$true] %s433_s22 }
  0x15   : > { %278 = vmatpush.msra.mxu1 %v261_v2  ;;  %v221_v6 = vld [vmem:[%s643_s1] sm:$0xff]  ;;  %s371_s26 = sshll.u32 %s217_s15, 3  ;;  %v257_v9 = vld [vmem:[%s645_s3 + $0x18] sm:$0xff]  ;;  %v256_v10 = vld [vmem:[%s645_s3 + $0x10] sm:$0xff]  ;;  %s435_s16 = scalar_lea.hbm %s434_s22, 8 }
  0x16   : > { %246 = vmatpush.msra.mxu0 %v223_v1  ;;  %s219_s7 = scalar_lea.vmem %s642_s0, %s371_s26  ;;  %v258_v7 = vld [vmem:[%s645_s3 + $0x20] sm:$0xff]  ;;  %v255_v11 = vld [vmem:[%s645_s3 + $0x8] sm:$0xff]  ;;  %s213_s26 = sand.u32 1, %s473_s19  }
  0x17   : > { %279 = vmatpush.msra.mxu1 %v260_v3  ;;  %v220_v8 = vld [vmem:[%s219_s7] sm:$0xff]  ;;  %s370_s30 = sshll.u32 %s213_s26, 3  ;;  %s292_s15 = scalar_lea.sflag [#allocation3], %s213_s26 }
  0x18   : > { %247 = vmatpush.msra.mxu0 %v222_v4  ;;  %v254_v12 = vld [vmem:[%s645_s3] sm:$0xff]  ;;  %s215_s12 = scalar_lea.vmem [#allocation2], %s370_s30  ;;  %p436_p11 = scmp.ne.s32.totalorder %s434_s22, %s435_s16 }
  0x19   : > { %280 = vmatpush.msra.mxu1 %v259_v5  ;;  %v417_v13 = vld [vmem:[%s644_s2] ss:$0 sm:$0xff]  ;;  %s304_s13 = sshll.u32 %s215_s12, 4  ;;  %p440_p0 = scmp.lt.s32.totalorder %s434_s22, %s647_s5  ;;  %s305_s13 = int_to_ptr.vmem [resolvable:$true] %s304_s13 }
  0x1a   : > { %248 = vmatpush.msra.mxu0 %v221_v6  ;;  %v418_v17 = vld [vmem:[%s646_s4] ss:$0 sm:$0xff]  ;;  %p437_p12 = pnand %p436_p11, %p551_p5  ;;  %p441_p1 = scmp.lt.s32.totalorder %s439_s25, %s435_s16 }
  0x1b   : > { %372 = vmatmul.msk.f32.vlgmr.msra.gmra.mxu0 %vm229_vm0, %v220_v8  ;;  %281 = vmatpush.msra.mxu1 %v258_v7 }
  0x1c   : > { %p438_p13 = pneg %p437_p12  ;;  %p442_p2 = por %p441_p1, %p440_p0 }
  0x1d   : > { %282 = vmatpush.msra.mxu1 %v257_v9 }
  0x1e   : > { %p443_p3 = pnand %p442_p2, %p438_p13 }
  0x1f   : > { %283 = vmatpush.msra.mxu1 %v256_v10 }
  0x21   : > { %284 = vmatpush.msra.mxu1 %v255_v11 }
  0x23   : > { %285 = vmatpush.msra.mxu1 %v254_v12 }
  0x98   : > { %v250_v14 = vpop.f32.mrf.mxu0 }
  0x99   : > { %v251_v15 = vadd.f32 %v417_v13, %v250_v14 }
  0x9b   : > { %v253_v16 = vmax.f32 %v251_v15, 0.0 }
  0x9d   : > { %373 = vmatmul.msk.f32.vlgmr.msra.gmra.mxu1 %vm266_vm1, %v253_v16 }
 0x11a   : > { %v287_v18 = vpop.f32.mrf.mxu1 }
 0x11b   : > { %v288_v19 = vadd.f32 %v418_v17, %v287_v18 }
 0x11d   : > { %290 = vst.msk [vmem:[%s215_s12] sm:$0xff] %vm229_vm0, %v288_v19 }
 0x11e   : > { %446 = shalt.err (!%p443_p3)
}
 0x11f   : > { %378 = dma.vmem_to_hbm [thread:$0]  (%p551_p5), %s305_s13, 128, %s307_s14, %s292_s15  }
 0x120 PF: > { %p384_p4 = scmp.ge.s32.totalorder %s481_s21, 2  ;;  %s318_s26 = sand.u32 1, %s469_s18  }
 0x121   : > { %s319_s7 = scalar_lea.sflag [#allocation3], %s318_s26 }
 0x122   : > { %p381_p7 = pnand %p384_p4, %p555_p6 }
 0x124   : > { %p382_p8 = pneg %p381_p7 }
 0x126   : > { %464 = dma.done.wait (%p382_p8), %s319_s7, 128  }
 0x127   : > { %466 = vsyncadd (%p382_p8), %s319_s7, 4294967168  ;;  %p15_p9 = scmp.ge.s32.totalorder %s538_s24, 4   ;;  %s650_s18 = smov %s473_s19 }
 0x128   : > { %s651_s19 = smov %s477_s20  ;;  %s652_s20 = smov %s549_s27 }
 0x129   : > { %s653_s21 = smov %s538_s24  ;;  %17 = sbr.rel (!%p15_p9) target bundleno = 3 (0x3), region = 75 }
 0x12e   :  { %325 = vsyncpa [#allocation3], 1 }
 0x12f   :  { %327 = vsyncpa [#allocation3 + $0x1], 1 }

</bundles_post_ra>
